<compile_context>
chip_gen: v6e
topology: v6e:2x2x1
jax: 0.10.0
libtpu: 0.0.40
codegen_flags: <defaults>
</compile_context>

<pallas_src>
import functools

import jax
import jax.numpy as jnp
from jax.experimental import pallas as pl
from jax.experimental.pallas import tpu as pltpu

_LANE = 128                    # TPU lane width (last dim)
_SUB = 8                       # f32 sublane tile


def _round_up(n, m):
    return ((n + m - 1) // m) * m


def _pad2(a, shape):
    pr, pc = shape[0] - a.shape[0], shape[1] - a.shape[1]
    if pr == 0 and pc == 0:
        return a
    return jnp.pad(a, ((0, pr), (0, pc)))


def _vmem_limit_bytes():
    """Per-generation scoped-VMEM limit: ~3/4 of physical capacity
    (~96 MiB on 128 MiB v5e/v6e, ~48 MiB on 64 MiB v7x), capped at 112 MiB."""
    cap = 128 * 1024 * 1024
    try:
        info = pltpu.get_tpu_info()
        cap = int(getattr(info, "vmem_capacity_bytes", cap))
    except Exception:
        pass
    return min((cap * 3) // 4, 112 * 1024 * 1024)


_VMEM_LIMIT = _vmem_limit_bytes()
_BIG_VMEM = _VMEM_LIMIT >= 80 * 1024 * 1024   # v5e/v6e class (128 MiB parts)
_ENC_TM = 512 if _BIG_VMEM else 256           # encoder row tile
_DEC_TM = 512                                 # decoder row tile
_DEC_TV = 512                                 # decoder vocab tile (mult of 128)


def _balanced_tile(rows, tm, mult=16):
    """Row tile that balances the last tile's zero padding (at most one
    sublane group of padded rows instead of up to a nearly-full wasted tile).
    Multiple of 16 for bf16 sublane packing."""
    n_tiles = max(1, pl.cdiv(rows, tm))
    return _round_up(pl.cdiv(rows, n_tiles), mult)


# ---------------------------------------------------------------------------
# Pallas kernels
# ---------------------------------------------------------------------------
def _encoder_ffn_kernel(x_ref, w1_ref, b1_ref, w2_ref, b2_ref, o_ref):
    """out = relu(x @ W1 + b1) @ W2 + b2  (one row-tile per grid step).

    bf16 MXU inputs, f32 accumulation.  The intermediate activation stays in
    vregs (no VMEM scratch round-trip between the two matmuls)."""
    h = jnp.dot(x_ref[...], w1_ref[...], preferred_element_type=jnp.float32)
    h = jnp.maximum(h + b1_ref[...], 0.0)
    o = jnp.dot(h.astype(jnp.bfloat16), w2_ref[...],
                preferred_element_type=jnp.float32) + b2_ref[...]
    o_ref[...] = o.astype(o_ref.dtype)


def _decoder_ce_kernel(x_ref, w_ref, b_ref, tgt_ref, wgt_ref,
                       *out_and_scratch, emit_logits):
    """Vocab-tiled projection + masked CE with online logsumexp.

    grid = (row_tiles, vocab_tiles); vocab axis is LAST and a reduction into
    the (m, l, target_logit) VMEM accumulators.  On the last vocab tile the
    masked per-tile loss / weight sums are emitted as one lane-dense
    (8, 128) slab (loss sum in [0, 0], weight sum in [0, 1])."""
    if emit_logits:
        logits_ref, losspart_ref, m_sc, l_sc, tl_sc = out_and_scratch
    else:
        losspart_ref, m_sc, l_sc, tl_sc = out_and_scratch

    j = pl.program_id(1)

    @pl.when(j == 0)
    def _():
        m_sc[...] = jnp.full_like(m_sc, -jnp.inf)
        l_sc[...] = jnp.zeros_like(l_sc)
        tl_sc[...] = jnp.zeros_like(tl_sc)

    logits = jnp.dot(x_ref[...], w_ref[...],
                     preferred_element_type=jnp.float32) + b_ref[...]
    if emit_logits:
        logits_ref[...] = logits.astype(logits_ref.dtype)

    # online (streaming) logsumexp over the vocab tiles, f32 throughout.
    m_prev = m_sc[...]
    m_new = jnp.maximum(m_prev, jnp.max(logits, axis=-1, keepdims=True))
    alpha = jnp.exp(m_prev - m_new)
    l_sc[...] = alpha * l_sc[...] + jnp.sum(jnp.exp(logits - m_new),
                                            axis=-1, keepdims=True)
    m_sc[...] = m_new

    # gather the target logit inside this vocab tile with a single select.
    tv = w_ref.shape[1]
    vocab_ids = jax.lax.broadcasted_iota(jnp.int32, logits.shape, 1) + j * tv
    tl_sc[...] = tl_sc[...] + jnp.sum(
        jnp.where(vocab_ids == tgt_ref[...], logits, 0.0),
        axis=-1, keepdims=True)

    # NOTE: losspart_ref's block index is (i, 0) for every vocab step j, so its
    # VMEM buffer is written back to HBM only after the last j for this row
    # tile; the vocab axis MUST remain the last, "arbitrary" grid axis for this
    # single final write to be the one that lands.
    @pl.when(j == pl.num_programs(1) - 1)
    def _():
        lse = m_sc[...] + jnp.log(l_sc[...])
        tok_loss = (lse - tl_sc[...]) * wgt_ref[...]          # masked per-token
        loss_sum = jnp.sum(tok_loss)
        w_sum = jnp.sum(wgt_ref[...])
        lane = jax.lax.broadcasted_iota(jnp.int32, (_SUB, _LANE), 1)
        sub = jax.lax.broadcasted_iota(jnp.int32, (_SUB, _LANE), 0)
        packed = jnp.where((sub == 0) & (lane == 0), loss_sum,
                           jnp.where((sub == 0) & (lane == 1), w_sum, 0.0))
        losspart_ref[...] = packed.astype(losspart_ref.dtype)


# ---------------------------------------------------------------------------
# Pallas wrappers
# ---------------------------------------------------------------------------
def encoder_ffn(x, w1, b1, w2, b2, *, tm=_ENC_TM):
    """x: [rows, D] -> bf16 [rows, H] via fused linear/relu/linear kernel."""
    rows, d = x.shape
    dh, do = w1.shape[1], w2.shape[1]

    # lane-pad feature / hidden / output dims to 128 (zero pad is exact).
    d_p, dh_p, do_p = (_round_up(v, _LANE) for v in (d, dh, do))
    w1p = _pad2(w1, (d_p, dh_p))
    b1p = _pad2(b1, (1, dh_p))
    w2p = _pad2(w2, (dh_p, do_p))
    b2p = _pad2(b2, (1, do_p))

    tm_eff = _balanced_tile(rows, tm)
    rows_p = _round_up(rows, tm_eff)
    xp = _pad2(x, (rows_p, d_p))

    # grid-invariant blocks: single buffer (no pointless double buffering).
    const = dict(pipeline_mode=pl.Buffered(1))

    flops = 2 * rows_p * (d_p * dh_p + dh_p * do_p)
    bytes_accessed = (rows_p * d_p * 2 + (d_p * dh_p + dh_p * do_p) * 2
                      + (dh_p + do_p) * 4 + rows_p * do_p * 2)

    out = pl.pallas_call(
        _encoder_ffn_kernel,
        out_shape=jax.ShapeDtypeStruct((rows_p, do_p), jnp.bfloat16),
        grid=(rows_p // tm_eff,),
        in_specs=[
            pl.BlockSpec((tm_eff, d_p), lambda i: (i, 0)),
            pl.BlockSpec((d_p, dh_p), lambda i: (0, 0), **const),
            pl.BlockSpec((1, dh_p), lambda i: (0, 0), **const),
            pl.BlockSpec((dh_p, do_p), lambda i: (0, 0), **const),
            pl.BlockSpec((1, do_p), lambda i: (0, 0), **const),
        ],
        out_specs=pl.BlockSpec((tm_eff, do_p), lambda i: (i, 0)),
        compiler_params=pltpu.CompilerParams(
            dimension_semantics=("parallel",),
            vmem_limit_bytes=_VMEM_LIMIT,
        ),
        cost_estimate=pl.CostEstimate(flops=flops, transcendentals=0,
                                      bytes_accessed=bytes_accessed),
    )(xp.astype(jnp.bfloat16), w1p.astype(jnp.bfloat16), b1p,
      w2p.astype(jnp.bfloat16), b2p)
    return out[:rows, :do]


def decoder_logits_and_ce(x, w_vocab, b_vocab, targets, weights,
                          *, tm=_DEC_TM, tv=_DEC_TV, emit_logits=True):
    """x: [rows, H], targets/weights: [rows, 1]
    -> (bf16 logits [rows, V] or None, masked loss sum, weight sum)."""
    rows, h = x.shape
    v = w_vocab.shape[1]
    assert v % _LANE == 0, "vocab must be a multiple of 128 lanes"
    tv_eff = min(tv, v)
    while v % tv_eff != 0:        # largest divisor of V that is <= tv
        tv_eff -= _LANE

    h_p = _round_up(h, _LANE)
    w_p = _pad2(w_vocab, (h_p, v))

    tm_eff = _balanced_tile(rows, tm)
    rows_p = _round_up(rows, tm_eff)
    xp = _pad2(x, (rows_p, h_p))
    tgt_p = _pad2(targets, (rows_p, 1))
    wgt_p = _pad2(weights, (rows_p, 1))          # padded rows get weight 0

    n_row = rows_p // tm_eff
    n_voc = v // tv_eff

    out_shape = []
    out_specs = []
    if emit_logits:
        out_shape.append(jax.ShapeDtypeStruct((rows_p, v), jnp.bfloat16))
        out_specs.append(pl.BlockSpec((tm_eff, tv_eff), lambda i, j: (i, j)))
    out_shape.append(
        jax.ShapeDtypeStruct((n_row * _SUB, _LANE), jnp.float32))
    out_specs.append(pl.BlockSpec((_SUB, _LANE), lambda i, j: (i, 0)))

    flops = 2 * rows_p * h_p * v
    transcendentals = rows_p * v                 # streaming exp over logits
    bytes_accessed = (rows_p * h_p * 2 + n_row * h_p * v * 2 + v * 4
                      + rows_p * 8 + n_row * _SUB * _LANE * 4
                      + (rows_p * v * 2 if emit_logits else 0))

    kernel = functools.partial(_decoder_ce_kernel, emit_logits=emit_logits)

    results = pl.pallas_call(
        kernel,
        out_shape=tuple(out_shape),
        grid=(n_row, n_voc),
        in_specs=[
            pl.BlockSpec((tm_eff, h_p), lambda i, j: (i, 0)),
            pl.BlockSpec((h_p, tv_eff), lambda i, j: (0, j)),
            pl.BlockSpec((1, tv_eff), lambda i, j: (0, j)),
            pl.BlockSpec((tm_eff, 1), lambda i, j: (i, 0)),
            pl.BlockSpec((tm_eff, 1), lambda i, j: (i, 0)),
        ],
        out_specs=out_specs,
        scratch_shapes=[
            pltpu.VMEM((tm_eff, 1), jnp.float32),   # running max
            pltpu.VMEM((tm_eff, 1), jnp.float32),   # running sum(exp)
            pltpu.VMEM((tm_eff, 1), jnp.float32),   # running target logit
        ],
        compiler_params=pltpu.CompilerParams(
            dimension_semantics=("parallel", "arbitrary"),
            vmem_limit_bytes=_VMEM_LIMIT,
        ),
        cost_estimate=pl.CostEstimate(flops=flops,
                                      transcendentals=transcendentals,
                                      bytes_accessed=bytes_accessed),
    )(xp.astype(jnp.bfloat16), w_p.astype(jnp.bfloat16), b_vocab,
      tgt_p.astype(jnp.int32), wgt_p.astype(jnp.float32))

    if emit_logits:
        logits, loss_parts = results
    else:
        logits = None
        loss_parts = results[0] if isinstance(results, (tuple, list)) else results

    loss_sum = jnp.sum(loss_parts[:, 0])
    w_sum = jnp.sum(loss_parts[:, 1])
    if emit_logits:
        return logits[:rows], loss_sum, w_sum
    return None, loss_sum, w_sum


# ---------------------------------------------------------------------------
# Synthetic wrapped model (the "model" that PipelineWrapper wraps)
# ---------------------------------------------------------------------------
def init_params(key, feat_dim, hidden, vocab):
    ks = jax.random.split(key, 6)
    s = 0.05
    return dict(
        w1=jax.random.normal(ks[0], (feat_dim, hidden), jnp.float32) * s,
        b1=jnp.zeros((1, hidden), jnp.float32),
        w2=jax.random.normal(ks[1], (hidden, hidden), jnp.float32) * s,
        b2=jnp.zeros((1, hidden), jnp.float32),
        embed=jax.random.normal(ks[2], (vocab, hidden), jnp.float32) * s,
        w_vocab=jax.random.normal(ks[3], (hidden, vocab), jnp.float32) * s,
        b_vocab=jnp.zeros((1, vocab), jnp.float32),
    )


def wrapped_forward(params, feature, feature_length, target_in, target_out,
                    target_length):
    """Synthetic conformer-style ASR forward: returns (loss, logits, enc_out)."""
    B, T, D = feature.shape
    U = target_in.shape[1]
    H = params["w2"].shape[1]
    V = params["w_vocab"].shape[1]

    # ---- encoder: fused FFN Pallas kernel over flattened [B*T, D] rows ----
    enc = encoder_ffn(feature.reshape(B * T, D),
                      params["w1"], params["b1"],
                      params["w2"], params["b2"])       # bf16 [B*T, H]
    enc = enc.reshape(B, T, H)

    # ---- masked mean pool over time using feature_length (glue, f32) ----
    t_ids = jnp.arange(T)[None, :]
    feat_mask = (t_ids < feature_length[:, None]).astype(jnp.float32)  # [B, T]
    enc32 = enc.astype(jnp.float32)
    ctx = jnp.sum(enc32 * feat_mask[:, :, None], axis=1) / jnp.maximum(
        jnp.sum(feat_mask, axis=1, keepdims=True), 1.0)  # [B, H]

    # ---- decoder: embedding lookup (glue) + Pallas projection/CE kernel ----
    emb = jnp.take(params["embed"], target_in, axis=0)          # [B, U, H]
    dec_in = (emb + ctx[:, None, :]).reshape(B * U, H)
    tgt_rows = target_out.reshape(B * U, 1).astype(jnp.int32)

    # target-length mask folded into the CE kernel as per-row weights.
    u_ids = jnp.arange(U)[None, :]
    tgt_mask = (u_ids < target_length[:, None]).astype(jnp.float32)   # [B, U]
    wgt_rows = tgt_mask.reshape(B * U, 1)

    logits_flat, loss_sum, w_sum = decoder_logits_and_ce(
        dec_in, params["w_vocab"], params["b_vocab"], tgt_rows, wgt_rows,
        emit_logits=True)

    logits = logits_flat.reshape(B, U, V)
    loss = loss_sum / jnp.maximum(w_sum, 1.0)
    return loss, logits, enc


def pipeline_wrapper_forward(params, feature, feature_length, target_in,
                             target_out, target_length):
    """PipelineWrapper.forward: pure pass-through to the wrapped model."""
    # TODO(synk): poptorch.BeginBlock / set_start_point are IPU pipeline
    # annotations with no TPU/Pallas equivalent; forward semantics are
    # unchanged by them, so only the pass-through forward is implemented.
    return wrapped_forward(params, feature, feature_length, target_in,
                           target_out, target_length)


# ---------------------------------------------------------------------------
# Main
# ---------------------------------------------------------------------------
if __name__ == "__main__":
    # Small but lane-friendly toy sizes (H, V multiples of 128; D is padded).
    B, T, D, H, U, V = 2, 16, 64, 128, 8, 256

    key = jax.random.PRNGKey(0)
    k_feat, k_tin, k_tout, k_param = jax.random.split(key, 4)

    feature = jax.random.normal(k_feat, (B, T, D), jnp.float32)
    feature_length = jnp.array([16, 12], jnp.int32)
    target_in = jax.random.randint(k_tin, (B, U), 0, V, jnp.int32)
    target_out = jax.random.randint(k_tout, (B, U), 0, V, jnp.int32)
    target_length = jnp.array([8, 6], jnp.int32)

    params = init_params(jax.random.PRNGKey(42), D, H, V)

    fwd = jax.jit(functools.partial(pipeline_wrapper_forward, params))
    loss, logits, enc = fwd(feature, feature_length, target_in, target_out,
                            target_length)
    jax.block_until_ready((loss, logits, enc))

    assert logits.shape == (B, U, V)
    assert enc.shape == (B, T, H)
    assert loss.shape == ()
    assert bool(jnp.isfinite(loss))
    assert bool(jnp.all(jnp.isfinite(logits.astype(jnp.float32))))
    print("KERNEL_OK")
</pallas_src>

<mosaic_0001>
module attributes {stable_mosaic.version = 11 : i64} {
  func.func @_encoder_ffn_kernel(%arg0: i32, %arg1: memref<32x128xbf16, #tpu.memory_space<vmem>>, %arg2: memref<128x128xbf16, #tpu.memory_space<vmem>>, %arg3: memref<1x128xf32, #tpu.memory_space<vmem>>, %arg4: memref<128x128xbf16, #tpu.memory_space<vmem>>, %arg5: memref<1x128xf32, #tpu.memory_space<vmem>>, %arg6: memref<32x128xbf16, #tpu.memory_space<vmem>>) attributes {dimension_semantics = [#tpu.dimension_semantics<parallel>], iteration_bounds = array<i64: 1>, scalar_prefetch = 0 : i64, scratch_operands = 0 : i64, tpu.core_type = #tpu.core_type<tc>, window_params = [{transform_indices = @transform_0, window_bounds = array<i64: 32, 128>}, {pipeline_mode = #tpu.pipeline_mode<synchronous>, transform_indices = @transform_1, window_bounds = array<i64: 128, 128>}, {pipeline_mode = #tpu.pipeline_mode<synchronous>, transform_indices = @transform_2, window_bounds = array<i64: 1, 128>}, {pipeline_mode = #tpu.pipeline_mode<synchronous>, transform_indices = @transform_3, window_bounds = array<i64: 128, 128>}, {pipeline_mode = #tpu.pipeline_mode<synchronous>, transform_indices = @transform_4, window_bounds = array<i64: 1, 128>}, {transform_indices = @transform_5, window_bounds = array<i64: 32, 128>}]} {
    %c0 = arith.constant 0 : index
    %c0_0 = arith.constant 0 : index
    %0 = vector.load %arg1[%c0, %c0_0] : memref<32x128xbf16, #tpu.memory_space<vmem>>, vector<32x128xbf16>
    %c0_1 = arith.constant 0 : index
    %c0_2 = arith.constant 0 : index
    %1 = vector.load %arg2[%c0_1, %c0_2] : memref<128x128xbf16, #tpu.memory_space<vmem>>, vector<128x128xbf16>
    %cst = arith.constant dense<0.000000e+00> : vector<32x128xf32>
    %2 = tpu.matmul %0, %1, %cst {dimension_numbers = #tpu.dot_dimension_numbers<[1], [0], [0], [1], [0, 0, 1, 1], [], []>} : vector<32x128xbf16>, vector<128x128xbf16>, vector<32x128xf32> -> vector<32x128xf32>
    %c0_3 = arith.constant 0 : index
    %c0_4 = arith.constant 0 : index
    %3 = vector.load %arg3[%c0_3, %c0_4] : memref<1x128xf32, #tpu.memory_space<vmem>>, vector<1x128xf32>
    %4 = vector.broadcast %3 : vector<1x128xf32> to vector<32x128xf32>
    %5 = arith.addf %2, %4 : vector<32x128xf32>
    %cst_5 = arith.constant 0.000000e+00 : f32
    %6 = vector.broadcast %cst_5 : f32 to vector<32x128xf32>
    %7 = arith.maximumf %5, %6 : vector<32x128xf32>
    %8 = arith.truncf %7 : vector<32x128xf32> to vector<32x128xbf16>
    %c0_6 = arith.constant 0 : index
    %c0_7 = arith.constant 0 : index
    %9 = vector.load %arg4[%c0_6, %c0_7] : memref<128x128xbf16, #tpu.memory_space<vmem>>, vector<128x128xbf16>
    %cst_8 = arith.constant dense<0.000000e+00> : vector<32x128xf32>
    %10 = tpu.matmul %8, %9, %cst_8 {dimension_numbers = #tpu.dot_dimension_numbers<[1], [0], [0], [1], [0, 0, 1, 1], [], []>} : vector<32x128xbf16>, vector<128x128xbf16>, vector<32x128xf32> -> vector<32x128xf32>
    %c0_9 = arith.constant 0 : index
    %c0_10 = arith.constant 0 : index
    %11 = vector.load %arg5[%c0_9, %c0_10] : memref<1x128xf32, #tpu.memory_space<vmem>>, vector<1x128xf32>
    %12 = vector.broadcast %11 : vector<1x128xf32> to vector<32x128xf32>
    %13 = arith.addf %10, %12 : vector<32x128xf32>
    %14 = arith.truncf %13 : vector<32x128xf32> to vector<32x128xbf16>
    %c0_11 = arith.constant 0 : index
    %c0_12 = arith.constant 0 : index
    %15 = vector.load %arg6[%c0_11, %c0_12] : memref<32x128xbf16, #tpu.memory_space<vmem>>, vector<32x128xbf16>
    tpu.vector_store %arg6[%c0_11, %c0_12], %14 {strides = array<i32>} : memref<32x128xbf16, #tpu.memory_space<vmem>>, vector<32x128xbf16>,
    return
  }
  func.func @transform_0(%arg0: i32) -> (i32, i32) {
    %c0_i32 = arith.constant 0 : i32
    %c0_i32_0 = arith.constant 0 : i32
    return %arg0, %c0_i32 : i32, i32
  }
  func.func @transform_1(%arg0: i32) -> (i32, i32) {
    %c0_i32 = arith.constant 0 : i32
    %c0_i32_0 = arith.constant 0 : i32
    %c0_i32_1 = arith.constant 0 : i32
    return %c0_i32, %c0_i32_0 : i32, i32
  }
  func.func @transform_2(%arg0: i32) -> (i32, i32) {
    %c0_i32 = arith.constant 0 : i32
    %c0_i32_0 = arith.constant 0 : i32
    %c0_i32_1 = arith.constant 0 : i32
    return %c0_i32, %c0_i32_0 : i32, i32
  }
  func.func @transform_3(%arg0: i32) -> (i32, i32) {
    %c0_i32 = arith.constant 0 : i32
    %c0_i32_0 = arith.constant 0 : i32
    %c0_i32_1 = arith.constant 0 : i32
    return %c0_i32, %c0_i32_0 : i32, i32
  }
  func.func @transform_4(%arg0: i32) -> (i32, i32) {
    %c0_i32 = arith.constant 0 : i32
    %c0_i32_0 = arith.constant 0 : i32
    %c0_i32_1 = arith.constant 0 : i32
    return %c0_i32, %c0_i32_0 : i32, i32
  }
  func.func @transform_5(%arg0: i32) -> (i32, i32) {
    %c0_i32 = arith.constant 0 : i32
    %c0_i32_0 = arith.constant 0 : i32
    return %arg0, %c0_i32 : i32, i32
  }
}

module attributes {stable_mosaic.version = 11 : i64} {
  func.func @_decoder_ce_kernel(%arg0: i32, %arg1: i32, %arg2: memref<16x128xbf16, #tpu.memory_space<vmem>>, %arg3: memref<128x256xbf16, #tpu.memory_space<vmem>>, %arg4: memref<1x256xf32, #tpu.memory_space<vmem>>, %arg5: memref<16x1xi32, #tpu.memory_space<vmem>>, %arg6: memref<16x1xf32, #tpu.memory_space<vmem>>, %arg7: memref<16x256xbf16, #tpu.memory_space<vmem>>, %arg8: memref<8x128xf32, #tpu.memory_space<vmem>>, %arg9: memref<16x1xf32, #tpu.memory_space<vmem>>, %arg10: memref<16x1xf32, #tpu.memory_space<vmem>>, %arg11: memref<16x1xf32, #tpu.memory_space<vmem>>) attributes {dimension_semantics = [#tpu.dimension_semantics<parallel>, #tpu.dimension_semantics<arbitrary>], iteration_bounds = array<i64: 1, 1>, scalar_prefetch = 0 : i64, scratch_operands = 3 : i64, tpu.core_type = #tpu.core_type<tc>, window_params = [{transform_indices = @transform_0, window_bounds = array<i64: 16, 128>}, {transform_indices = @transform_1, window_bounds = array<i64: 128, 256>}, {transform_indices = @transform_2, window_bounds = array<i64: 1, 256>}, {transform_indices = @transform_3, window_bounds = array<i64: 16, 1>}, {transform_indices = @transform_4, window_bounds = array<i64: 16, 1>}, {transform_indices = @transform_5, window_bounds = array<i64: 16, 256>}, {transform_indices = @transform_6, window_bounds = array<i64: 8, 128>}]} {
    %c0_i32 = arith.constant 0 : i32
    %0 = arith.cmpi eq, %arg1, %c0_i32 : i32
    %1 = arith.extui %0 : i1 to i32
    %c0_i32_0 = arith.constant 0 : i32
    %2 = arith.cmpi ne, %1, %c0_i32_0 : i32
    scf.if %2 {
      %cst_28 = arith.constant 0xFF800000 : f32
      %44 = vector.broadcast %cst_28 : f32 to vector<16x1xf32>
      %c0_29 = arith.constant 0 : index
      %c0_30 = arith.constant 0 : index
      %45 = vector.load %arg9[%c0_29, %c0_30] : memref<16x1xf32, #tpu.memory_space<vmem>>, vector<16x1xf32>
      tpu.vector_store %arg9[%c0_29, %c0_30], %44 {strides = array<i32>} : memref<16x1xf32, #tpu.memory_space<vmem>>, vector<16x1xf32>,
      %cst_31 = arith.constant 0.000000e+00 : f32
      %46 = vector.broadcast %cst_31 : f32 to vector<16x1xf32>
      %c0_32 = arith.constant 0 : index
      %c0_33 = arith.constant 0 : index
      %47 = vector.load %arg10[%c0_32, %c0_33] : memref<16x1xf32, #tpu.memory_space<vmem>>, vector<16x1xf32>
      tpu.vector_store %arg10[%c0_32, %c0_33], %46 {strides = array<i32>} : memref<16x1xf32, #tpu.memory_space<vmem>>, vector<16x1xf32>,
      %cst_34 = arith.constant 0.000000e+00 : f32
      %48 = vector.broadcast %cst_34 : f32 to vector<16x1xf32>
      %c0_35 = arith.constant 0 : index
      %c0_36 = arith.constant 0 : index
      %49 = vector.load %arg11[%c0_35, %c0_36] : memref<16x1xf32, #tpu.memory_space<vmem>>, vector<16x1xf32>
      tpu.vector_store %arg11[%c0_35, %c0_36], %48 {strides = array<i32>} : memref<16x1xf32, #tpu.memory_space<vmem>>, vector<16x1xf32>,
    } else {
    }
    %c0 = arith.constant 0 : index
    %c0_1 = arith.constant 0 : index
    %3 = vector.load %arg2[%c0, %c0_1] : memref<16x128xbf16, #tpu.memory_space<vmem>>, vector<16x128xbf16>
    %c0_2 = arith.constant 0 : index
    %c0_3 = arith.constant 0 : index
    %4 = vector.load %arg3[%c0_2, %c0_3] : memref<128x256xbf16, #tpu.memory_space<vmem>>, vector<128x256xbf16>
    %cst = arith.constant dense<0.000000e+00> : vector<16x256xf32>
    %5 = tpu.matmul %3, %4, %cst {dimension_numbers = #tpu.dot_dimension_numbers<[1], [0], [0], [1], [0, 0, 1, 1], [], []>} : vector<16x128xbf16>, vector<128x256xbf16>, vector<16x256xf32> -> vector<16x256xf32>
    %c0_4 = arith.constant 0 : index
    %c0_5 = arith.constant 0 : index
    %6 = vector.load %arg4[%c0_4, %c0_5] : memref<1x256xf32, #tpu.memory_space<vmem>>, vector<1x256xf32>
    %7 = vector.broadcast %6 : vector<1x256xf32> to vector<16x256xf32>
    %8 = arith.addf %5, %7 : vector<16x256xf32>
    %9 = arith.truncf %8 : vector<16x256xf32> to vector<16x256xbf16>
    %c0_6 = arith.constant 0 : index
    %c0_7 = arith.constant 0 : index
    %10 = vector.load %arg7[%c0_6, %c0_7] : memref<16x256xbf16, #tpu.memory_space<vmem>>, vector<16x256xbf16>
    tpu.vector_store %arg7[%c0_6, %c0_7], %9 {strides = array<i32>} : memref<16x256xbf16, #tpu.memory_space<vmem>>, vector<16x256xbf16>,
    %c0_8 = arith.constant 0 : index
    %c0_9 = arith.constant 0 : index
    %11 = vector.load %arg9[%c0_8, %c0_9] : memref<16x1xf32, #tpu.memory_space<vmem>>, vector<16x1xf32>
    %cst_10 = arith.constant dense<0xFF800000> : vector<16xf32>
    %12 = vector.multi_reduction <maximumf>, %8, %cst_10 [1] : vector<16x256xf32> to vector<16xf32>
    %13 = vector.shape_cast %12 : vector<16xf32> to vector<16x1xf32>
    %14 = arith.maximumf %11, %13 : vector<16x1xf32>
    %15 = arith.subf %11, %14 : vector<16x1xf32>
    %16 = math.exp %15 : vector<16x1xf32>
    %c0_11 = arith.constant 0 : index
    %c0_12 = arith.constant 0 : index
    %17 = vector.load %arg10[%c0_11, %c0_12] : memref<16x1xf32, #tpu.memory_space<vmem>>, vector<16x1xf32>
    %18 = arith.mulf %16, %17 : vector<16x1xf32>
    %19 = vector.broadcast %14 : vector<16x1xf32> to vector<16x256xf32>
    %20 = arith.subf %8, %19 : vector<16x256xf32>
    %21 = math.exp %20 : vector<16x256xf32>
    %cst_13 = arith.constant dense<0.000000e+00> : vector<16xf32>
    %22 = vector.multi_reduction <add>, %21, %cst_13 [1] : vector<16x256xf32> to vector<16xf32>
    %23 = vector.shape_cast %22 : vector<16xf32> to vector<16x1xf32>
    %24 = arith.addf %18, %23 : vector<16x1xf32>
    %c0_14 = arith.constant 0 : index
    %c0_15 = arith.constant 0 : index
    %25 = vector.load %arg10[%c0_14, %c0_15] : memref<16x1xf32, #tpu.memory_space<vmem>>, vector<16x1xf32>
    tpu.vector_store %arg10[%c0_14, %c0_15], %24 {strides = array<i32>} : memref<16x1xf32, #tpu.memory_space<vmem>>, vector<16x1xf32>,
    %c0_16 = arith.constant 0 : index
    %c0_17 = arith.constant 0 : index
    %26 = vector.load %arg9[%c0_16, %c0_17] : memref<16x1xf32, #tpu.memory_space<vmem>>, vector<16x1xf32>
    tpu.vector_store %arg9[%c0_16, %c0_17], %14 {strides = array<i32>} : memref<16x1xf32, #tpu.memory_space<vmem>>, vector<16x1xf32>,
    %27 = tpu.iota {dimensions = array<i32: 1>} : vector<16x256xi32>
    %c256_i32 = arith.constant 256 : i32
    %28 = arith.muli %arg1, %c256_i32 : i32
    %29 = vector.broadcast %28 : i32 to vector<16x256xi32>
    %30 = arith.addi %27, %29 : vector<16x256xi32>
    %c0_18 = arith.constant 0 : index
    %c0_19 = arith.constant 0 : index
    %31 = vector.load %arg11[%c0_18, %c0_19] : memref<16x1xf32, #tpu.memory_space<vmem>>, vector<16x1xf32>
    %c0_20 = arith.constant 0 : index
    %c0_21 = arith.constant 0 : index
    %32 = vector.load %arg5[%c0_20, %c0_21] : memref<16x1xi32, #tpu.memory_space<vmem>>, vector<16x1xi32>
    %33 = vector.broadcast %32 : vector<16x1xi32> to vector<16x256xi32>
    %34 = arith.cmpi eq, %30, %33 : vector<16x256xi32>
    %cst_22 = arith.constant 0.000000e+00 : f32
    %35 = vector.broadcast %cst_22 : f32 to vector<16x256xf32>
    %36 = arith.select %34, %8, %35 : vector<16x256xi1>, vector<16x256xf32>
    %cst_23 = arith.constant dense<0.000000e+00> : vector<16xf32>
    %37 = vector.multi_reduction <add>, %36, %cst_23 [1] : vector<16x256xf32> to vector<16xf32>
    %38 = vector.shape_cast %37 : vector<16xf32> to vector<16x1xf32>
    %39 = arith.addf %31, %38 : vector<16x1xf32>
    %c0_24 = arith.constant 0 : index
    %c0_25 = arith.constant 0 : index
    %40 = vector.load %arg11[%c0_24, %c0_25] : memref<16x1xf32, #tpu.memory_space<vmem>>, vector<16x1xf32>
    tpu.vector_store %arg11[%c0_24, %c0_25], %39 {strides = array<i32>} : memref<16x1xf32, #tpu.memory_space<vmem>>, vector<16x1xf32>,
    %c0_i32_26 = arith.constant 0 : i32
    %41 = arith.cmpi eq, %arg1, %c0_i32_26 : i32
    %42 = arith.extui %41 : i1 to i32
    %c0_i32_27 = arith.constant 0 : i32
    %43 = arith.cmpi ne, %42, %c0_i32_27 : i32
    scf.if %43 {
      %c0_28 = arith.constant 0 : index
      %c0_29 = arith.constant 0 : index
      %44 = vector.load %arg9[%c0_28, %c0_29] : memref<16x1xf32, #tpu.memory_space<vmem>>, vector<16x1xf32>
      %c0_30 = arith.constant 0 : index
      %c0_31 = arith.constant 0 : index
      %45 = vector.load %arg10[%c0_30, %c0_31] : memref<16x1xf32, #tpu.memory_space<vmem>>, vector<16x1xf32>
      %46 = math.log %45 : vector<16x1xf32>
      %47 = arith.addf %44, %46 : vector<16x1xf32>
      %c0_32 = arith.constant 0 : index
      %c0_33 = arith.constant 0 : index
      %48 = vector.load %arg11[%c0_32, %c0_33] : memref<16x1xf32, #tpu.memory_space<vmem>>, vector<16x1xf32>
      %49 = arith.subf %47, %48 : vector<16x1xf32>
      %c0_34 = arith.constant 0 : index
      %c0_35 = arith.constant 0 : index
      %50 = vector.load %arg6[%c0_34, %c0_35] : memref<16x1xf32, #tpu.memory_space<vmem>>, vector<16x1xf32>
      %51 = arith.mulf %49, %50 : vector<16x1xf32>
      %52 = vector.shape_cast %51 : vector<16x1xf32> to vector<1x16x1xf32>
      %cst_36 = arith.constant dense<0.000000e+00> : vector<1xf32>
      %53 = vector.multi_reduction <add>, %52, %cst_36 [1, 2] : vector<1x16x1xf32> to vector<1xf32>
      %54 = vector.shape_cast %53 : vector<1xf32> to vector<1x1x1xf32>
      %55 = vector.extract %54[0, 0, 0] : f32 from vector<1x1x1xf32>
      %c0_37 = arith.constant 0 : index
      %c0_38 = arith.constant 0 : index
      %56 = vector.load %arg6[%c0_37, %c0_38] : memref<16x1xf32, #tpu.memory_space<vmem>>, vector<16x1xf32>
      %57 = vector.shape_cast %56 : vector<16x1xf32> to vector<1x16x1xf32>
      %cst_39 = arith.constant dense<0.000000e+00> : vector<1xf32>
      %58 = vector.multi_reduction <add>, %57, %cst_39 [1, 2] : vector<1x16x1xf32> to vector<1xf32>
      %59 = vector.shape_cast %58 : vector<1xf32> to vector<1x1x1xf32>
      %60 = vector.extract %59[0, 0, 0] : f32 from vector<1x1x1xf32>
      %61 = tpu.iota {dimensions = array<i32: 1>} : vector<8x128xi32>
      %62 = tpu.iota {dimensions = array<i32: 0>} : vector<8x128xi32>
      %c0_i32_40 = arith.constant 0 : i32
      %63 = vector.broadcast %c0_i32_40 : i32 to vector<8x128xi32>
      %64 = arith.cmpi eq, %62, %63 : vector<8x128xi32>
      %c0_i32_41 = arith.constant 0 : i32
      %65 = vector.broadcast %c0_i32_41 : i32 to vector<8x128xi32>
      %66 = arith.cmpi eq, %61, %65 : vector<8x128xi32>
      %67 = arith.andi %64, %66 : vector<8x128xi1>
      %c0_i32_42 = arith.constant 0 : i32
      %68 = vector.broadcast %c0_i32_42 : i32 to vector<8x128xi32>
      %69 = arith.cmpi eq, %62, %68 : vector<8x128xi32>
      %c1_i32 = arith.constant 1 : i32
      %70 = vector.broadcast %c1_i32 : i32 to vector<8x128xi32>
      %71 = arith.cmpi eq, %61, %70 : vector<8x128xi32>
      %72 = arith.andi %69, %71 : vector<8x128xi1>
      %cst_43 = arith.constant 0.000000e+00 : f32
      %73 = vector.broadcast %60 : f32 to vector<8x128xf32>
      %74 = vector.broadcast %cst_43 : f32 to vector<8x128xf32>
      %75 = arith.select %72, %73, %74 : vector<8x128xi1>, vector<8x128xf32>
      %76 = vector.broadcast %55 : f32 to vector<8x128xf32>
      %77 = arith.select %67, %76, %75 : vector<8x128xi1>, vector<8x128xf32>
      %c0_44 = arith.constant 0 : index
      %c0_45 = arith.constant 0 : index
      %78 = vector.load %arg8[%c0_44, %c0_45] : memref<8x128xf32, #tpu.memory_space<vmem>>, vector<8x128xf32>
      tpu.vector_store %arg8[%c0_44, %c0_45], %77 {strides = array<i32>} : memref<8x128xf32, #tpu.memory_space<vmem>>, vector<8x128xf32>,
    } else {
    }
    return
  }
  func.func @transform_0(%arg0: i32, %arg1: i32) -> (i32, i32) {
    %c0_i32 = arith.constant 0 : i32
    %c0_i32_0 = arith.constant 0 : i32
    return %arg0, %c0_i32 : i32, i32
  }
  func.func @transform_1(%arg0: i32, %arg1: i32) -> (i32, i32) {
    %c0_i32 = arith.constant 0 : i32
    %c0_i32_0 = arith.constant 0 : i32
    return %c0_i32, %arg1 : i32, i32
  }
  func.func @transform_2(%arg0: i32, %arg1: i32) -> (i32, i32) {
    %c0_i32 = arith.constant 0 : i32
    %c0_i32_0 = arith.constant 0 : i32
    return %c0_i32, %arg1 : i32, i32
  }
  func.func @transform_3(%arg0: i32, %arg1: i32) -> (i32, i32) {
    %c0_i32 = arith.constant 0 : i32
    %c0_i32_0 = arith.constant 0 : i32
    return %arg0, %c0_i32 : i32, i32
  }
  func.func @transform_4(%arg0: i32, %arg1: i32) -> (i32, i32) {
    %c0_i32 = arith.constant 0 : i32
    %c0_i32_0 = arith.constant 0 : i32
    return %arg0, %c0_i32 : i32, i32
  }
  func.func @transform_5(%arg0: i32, %arg1: i32) -> (i32, i32) {
    %c0_i32 = arith.constant 0 : i32
    return %arg0, %arg1 : i32, i32
  }
  func.func @transform_6(%arg0: i32, %arg1: i32) -> (i32, i32) {
    %c0_i32 = arith.constant 0 : i32
    %c0_i32_0 = arith.constant 0 : i32
    return %arg0, %c0_i32 : i32, i32
  }
}

</mosaic_0001>

<bundles_post_ra>
// kernel: pipeline_wrapper_forward.2
= control target key start
LH: loop header
LB: loop body
LE: loop exit
PB: predicated region body
PF: predicated region fallthrough
CT: control target
= control target key end

     0   :  { %s520_s1 = inlined_call_operand.vmem [shape: bf16[128,128], index: 1, kind: input, shape index: {}]   ;;  %s521_s0 = inlined_call_operand.vmem [shape: bf16[32,128], index: 0, kind: input, shape index: {}]   ;;  %s522_s3 = inlined_call_operand.vmem [shape: bf16[128,128], index: 3, kind: input, shape index: {}]   ;;  %s523_s2 = inlined_call_operand.vmem [shape: f32[1,128], index: 2, kind: input, shape index: {}, may-alias: {2,4}]   ;;  %s524_s4 = inlined_call_operand.vmem [shape: f32[1,128], index: 4, kind: input, shape index: {}, may-alias: {2,4}]   ;;  %s525_s5 = inlined_call_operand.vmem [shape: bf16[32,128], index: 5, kind: output, shape index: {}]  }
   0x1   :  { %v406_v0 = vld [vmem:[%s520_s1 + $0x38] sm:$0xff]   ;;  %v407_v1 = vld [vmem:[%s520_s1 + $0x30] sm:$0xff]   ;;  %v408_v2 = vld [vmem:[%s520_s1 + $0x28] sm:$0xff]  }
   0x2   :  { %366 = vmatprep.subr.bf16.mxu0 %v406_v0  ;;  %v409_v3 = vld [vmem:[%s520_s1 + $0x20] sm:$0xff]   ;;  %v416_v5 = vld [vmem:[%s522_s3 + $0x38] sm:$0xff]   ;;  %v417_v6 = vld [vmem:[%s522_s3 + $0x30] sm:$0xff]  }
   0x3   :  { %367 = vmatpush3.bf16.msra.mxu0 %v406_v0  ;;  %v414_v4 = vld [vmem:[%s521_s0] sm:$0xff]   ;;  %v410_v7 = vld [vmem:[%s520_s1 + $0x18] sm:$0xff]   ;;  %386 = vmatprep.subr.bf16.mxu1 %v416_v5  ;;  %v411_v8 = vld [vmem:[%s520_s1 + $0x10] sm:$0xff]  }
   0x4   :  { %368 = vmatprep.subr.bf16.mxu0 %v407_v1  ;;  %382 = vmatprep.mubr.bf16.mxu0 %v414_v4  ;;  %v418_v9 = vld [vmem:[%s522_s3 + $0x28] sm:$0xff]   ;;  %v419_v10 = vld [vmem:[%s522_s3 + $0x20] sm:$0xff]   ;;  %v420_v12 = vld [vmem:[%s522_s3 + $0x18] sm:$0xff]  }
   0x5   :  { %387 = vmatpush3.bf16.msra.mxu1 %v416_v5  ;;  %v412_v11 = vld [vmem:[%s520_s1 + $0x8] sm:$0xff]   ;;  %v413_v13 = vld [vmem:[%s520_s1] sm:$0xff]   ;;  %v421_v15 = vld [vmem:[%s522_s3 + $0x10] sm:$0xff]  }
   0x6   :  { %388 = vmatprep.subr.bf16.mxu1 %v417_v6  ;;  %v415_v14 = vld [vmem:[%s521_s0 + $0x8] sm:$0xff]   ;;  %v423_v17 = vld [vmem:[%s522_s3] sm:$0xff]  }
   0x7   :  { %369 = vmatpush3.bf16.msra.mxu0 %v407_v1  ;;  %v422_v16 = vld [vmem:[%s522_s3 + $0x8] sm:$0xff]   ;;  %v307_v20 = vld [vmem:[%s523_s2] ss:$0 sm:$0xff] }
   0x8   :  { %370 = vmatprep.subr.bf16.mxu0 %v408_v2  ;;  %v318_v34 = vld [vmem:[%s524_s4] ss:$0 sm:$0xff] }
   0x9   :  { %389 = vmatpush3.bf16.msra.mxu1 %v417_v6 }
   0xa   :  { %390 = vmatprep.subr.bf16.mxu1 %v418_v9 }
   0xb   :  { %371 = vmatpush3.bf16.msra.mxu0 %v408_v2 }
   0xc   :  { %372 = vmatprep.subr.bf16.mxu0 %v409_v3 }
   0xd   :  { %391 = vmatpush3.bf16.msra.mxu1 %v418_v9 }
   0xe   :  { %392 = vmatprep.subr.bf16.mxu1 %v419_v10 }
   0xf   :  { %373 = vmatpush3.bf16.msra.mxu0 %v409_v3 }
  0x10   :  { %374 = vmatprep.subr.bf16.mxu0 %v410_v7 }
  0x11   :  { %393 = vmatpush3.bf16.msra.mxu1 %v419_v10 }
  0x12   :  { %394 = vmatprep.subr.bf16.mxu1 %v420_v12 }
  0x13   :  { %375 = vmatpush3.bf16.msra.mxu0 %v410_v7 }
  0x14   :  { %376 = vmatprep.subr.bf16.mxu0 %v411_v8 }
  0x15   :  { %395 = vmatpush3.bf16.msra.mxu1 %v420_v12 }
  0x16   :  { %396 = vmatprep.subr.bf16.mxu1 %v421_v15 }
  0x17   :  { %377 = vmatpush3.bf16.msra.mxu0 %v411_v8 }
  0x18   :  { %378 = vmatprep.subr.bf16.mxu0 %v412_v11 }
  0x19   :  { %397 = vmatpush3.bf16.msra.mxu1 %v421_v15 }
  0x1a   :  { %398 = vmatprep.subr.bf16.mxu1 %v422_v16 }
  0x1b   :  { %379 = vmatpush3.bf16.msra.mxu0 %v412_v11 }
  0x1c   :  { %380 = vmatprep.subr.bf16.mxu0 %v413_v13 }
  0x1d   :  { %399 = vmatpush3.bf16.msra.mxu1 %v422_v16 }
  0x1e   :  { %400 = vmatprep.subr.bf16.mxu1 %v423_v17 }
  0x1f   :  { %381 = vmatpush3.bf16.msra.mxu0 %v413_v13 }
  0x21   :  { %401 = vmatpush3.bf16.msra.mxu1 %v423_v17 }
  0x22   :  { %383 = vmatmul.mubr.bf16.vlgmr.msra.gmra.mxu0 %v415_v14 }
  0xe2   :  { %v384_v18 = vpop.f32.mrf.mxu0 }
  0xe3   :  { %v151_v24 = vadd.f32 %v384_v18, %v307_v20 }
  0xe4   :  { %v142_v19 = vpop.f32.mrf.mxu0 }
  0xe5   :  { %v143_v22 = vadd.f32 %v307_v20, %v142_v19  ;;  %v159_v30 = vmax.f32 %v151_v24, 0.0 }
  0xe6   :  { %v385_v21 = vpop.f32.mrf.mxu0 }
  0xe7   :  { %v154_v23 = vadd.f32 %v385_v21, %v307_v20  ;;  %v157_v28 = vmax.f32 %v143_v22, 0.0 }
  0xe8   :  { %v145_v25 = vpop.f32.mrf.mxu0 }
  0xe9   :  { %v146_v26 = vadd.f32 %v307_v20, %v145_v25  ;;  %v160_v27 = vmax.f32 %v154_v23, 0.0 }
  0xeb   :  { %v158_v29 = vmax.f32 %v146_v26, 0.0  ;;  %v162_v32 = vpack.c.bf16 %v160_v27, %v159_v30 }
  0xed   :  { %v161_v31 = vpack.c.bf16 %v158_v29, %v157_v28 }
  0xef   :  { %402 = vmatprep.mubr.bf16.mxu1 %v161_v31 }
  0xf0   :  { %403 = vmatmul.mubr.bf16.vlgmr.msra.gmra.mxu1 %v162_v32 }
 0x1b0   :  { %v404_v33 = vpop.f32.mrf.mxu1 }
 0x1b1   :  { %v277_v37 = vadd.f32 %v404_v33, %v318_v34 }
 0x1b2   :  { %v268_v35 = vpop.f32.mrf.mxu1 }
 0x1b3   :  { %v269_v40 = vadd.f32 %v318_v34, %v268_v35 }
 0x1b4   :  { %v405_v36 = vpop.f32.mrf.mxu1 }
 0x1b5   :  { %v280_v38 = vadd.f32 %v405_v36, %v318_v34 }
 0x1b6   :  { %v271_v39 = vpop.f32.mrf.mxu1 }
 0x1b7   :  { %v343_v41 = vpack.c.bf16 %v280_v38, %v277_v37  ;;  %v272_v42 = vadd.f32 %v318_v34, %v271_v39 }
 0x1b9   :  { %345 = vst [vmem:[%s525_s5 + $0x8] sm:$0xff] %v343_v41   ;;  %v338_v43 = vpack.c.bf16 %v272_v42, %v269_v40 }
 0x1bb   :  { %339 = vst [vmem:[%s525_s5] sm:$0xff] %v338_v43  }

// kernel: pipeline_wrapper_forward.3
= control target key start
LH: loop header
LB: loop body
LE: loop exit
PB: predicated region body
PF: predicated region fallthrough
CT: control target
= control target key end

     0   :  { %v471_v2 = vmov 0   ;;  %s624_s0 = inlined_call_operand.vmem [shape: bf16[16,128], index: 0, kind: input, shape index: {}]   ;;  %s625_s1 = inlined_call_operand.vmem [shape: bf16[128,256], index: 1, kind: input, shape index: {}]   ;;  %s626_s2 = inlined_call_operand.vmem [shape: f32[1,256], index: 2, kind: input, shape index: {}]   ;;  %s627_s3 = inlined_call_operand.vmem [shape: s32[16,1], index: 3, kind: input, shape index: {}]   ;;  %s628_s4 = inlined_call_operand.vmem [shape: f32[16,1], index: 4, kind: input, shape index: {}]   ;;  %s629_s5 = inlined_call_operand.hbm [shape: bf16[16,256], index: 5, kind: output, shape index: {0}]   ;;  %s630_s6 = inlined_call_operand.vmem [shape: f32[8,128], index: 6, kind: output, shape index: {1}]  }
   0x1   :  { %v408_v0 = vld [vmem:[%s625_s1 + $0x74] ss:$8 sps:$4 sm:$0xff]   ;;  %v410_v1 = vld [vmem:[%s625_s1 + $0x70] ss:$8 sps:$4 sm:$0xff]   ;;  %183 = vmatprep.mubr.bf16.mxu0 %v471_v2  ;;  %407 = vset.pattern.permute.xlu0 %v471_v2  ;;  %v411_v3 = vld [vmem:[%s625_s1 + $0x64] ss:$8 sps:$4 sm:$0xff]  }
   0x2   :  { %151 = vmatprep.subr.bf16.mxu0 %v408_v0  ;;  %406 = vset.pattern.permute.xlu1 %v471_v2  ;;  %v413_v4 = vld [vmem:[%s625_s1 + $0x60] ss:$8 sps:$4 sm:$0xff]   ;;  %v414_v5 = vld [vmem:[%s625_s1 + $0x54] ss:$8 sps:$4 sm:$0xff]   ;;  %v416_v6 = vld [vmem:[%s625_s1 + $0x50] ss:$8 sps:$4 sm:$0xff]  }
   0x3   :  { %152 = vmatpush1.bf16.msra.mxu0 %v410_v1  ;;  %v417_v7 = vld [vmem:[%s625_s1 + $0x44] ss:$8 sps:$4 sm:$0xff]   ;;  %v419_v8 = vld [vmem:[%s625_s1 + $0x40] ss:$8 sps:$4 sm:$0xff]   ;;  %v420_v9 = vld [vmem:[%s625_s1 + $0x34] ss:$8 sps:$4 sm:$0xff]  }
   0x4   :  { %153 = vmatprep.subr.bf16.mxu0 %v411_v3 }
   0x7   :  { %154 = vmatpush1.bf16.msra.mxu0 %v413_v4 }
   0x8   :  { %155 = vmatprep.subr.bf16.mxu0 %v414_v5 }
   0xb   :  { %156 = vmatpush1.bf16.msra.mxu0 %v416_v6 }
   0xc   :  { %157 = vmatprep.subr.bf16.mxu0 %v417_v7 }
   0xd   :  { %12 = vsyncpa [#allocation6], 0  ;;  %v422_v10 = vld [vmem:[%s625_s1 + $0x30] ss:$8 sps:$4 sm:$0xff]   ;;  %v423_v11 = vld [vmem:[%s625_s1 + $0x24] ss:$8 sps:$4 sm:$0xff]   ;;  %v55_v18 = vlaneseq }
   0xe   :  { %v425_v12 = vld [vmem:[%s625_s1 + $0x20] ss:$8 sps:$4 sm:$0xff]   ;;  %v426_v13 = vld [vmem:[%s625_s1 + $0x14] ss:$8 sps:$4 sm:$0xff]   ;;  %v428_v14 = vld [vmem:[%s625_s1 + $0x10] ss:$8 sps:$4 sm:$0xff]  }
   0xf   :  { %158 = vmatpush1.bf16.msra.mxu0 %v419_v8  ;;  %v429_v15 = vld [vmem:[%s625_s1 + $0x4] ss:$8 sps:$4 sm:$0xff]   ;;  %v431_v16 = vld [vmem:[%s625_s1] ss:$8 sps:$4 sm:$0xff]   ;;  %v563_v19 = vshrl.u32 %v55_v18, 7  ;;  %vm28_vm0 = vcmask 7168  }
  0x10   :  { %159 = vmatprep.subr.bf16.mxu0 %v420_v9  ;;  %v432_v17 = vld [vmem:[%s624_s0] sm:$0xff]   ;;  %v472_v37 = vmov -inf   ;;  %v473_v39 = vmov 0.0   ;;  %v588_v46 = vand.u32 127, %v55_v18  ;;  %v273_v49 = vld [vmem:[%s627_s3 + $0x8] sm:$0xff]  ;;  %s474_s13 = smov [#allocation5]  }
  0x11   :  { %v57_v20 = vsub.s32 0, %v563_v19  ;;  %v61_v21 = vsub.s32 1, %v563_v19  ;;  %v53_v22 = vld [vmem:[%s626_s2] sm:$0x3]  ;;  %29 = vst.msk [vmem:[#allocation2] sm:$0xff] %vm28_vm0, %v472_v37  ;;  %30 = vst.msk [vmem:[#allocation2 + $0x8] sm:$0xff] %vm28_vm0, %v472_v37 }
  0x12   :  { %v272_v38 = vld [vmem:[%s627_s3] sm:$0xff]  ;;  %33 = vst.msk [vmem:[#allocation4] sm:$0xff] %vm28_vm0, %v473_v39  ;;  %31 = vst.msk [vmem:[#allocation3] sm:$0xff] %vm28_vm0, %v473_v39  ;;  %v265_v50 = vadd.s32 128, %v588_v46  ;;  %s360_s14 = sshll.u32 %s474_s13, 4  ;;  %s361_s14 = int_to_ptr.vmem [resolvable:$true] %s360_s14 }
  0x13   :  { %160 = vmatpush1.bf16.msra.mxu0 %v422_v10  ;;  %v58_v23 = vrot.slane %v53_v22, %v57_v20  ;;  %v62_v24 = vrot.slane %v53_v22, %v61_v21  ;;  %32 = vst.msk [vmem:[#allocation3 + $0x8] sm:$0xff] %vm28_vm0, %v473_v39  ;;  %34 = vst.msk [vmem:[#allocation4 + $0x8] sm:$0xff] %vm28_vm0, %v473_v39  ;;  %s449_s15 = scalar_lea.vmem %s361_s14, 256  ;;  %p454_p1 = scmp.lt.s32.totalorder %s361_s14, %s361_s14 }
  0x14   :  { %161 = vmatprep.subr.bf16.mxu0 %v423_v11  ;;  %p450_p0 = scmp.ne.s32.totalorder %s361_s14, %s449_s15  ;;  %p455_p2 = scmp.lt.s32.totalorder %s449_s15, %s449_s15 }
  0x16   :  { %p456_p3 = por %p455_p2, %p454_p1 }
  0x17   :  { %162 = vmatpush1.bf16.msra.mxu0 %v425_v12 }
  0x18   :  { %163 = vmatprep.subr.bf16.mxu0 %v426_v13  ;;  %v208_v40 = vld [vmem:[#allocation2] sm:$0xff]  ;;  %v209_v43 = vld [vmem:[#allocation2 + $0x8] sm:$0xff]  ;;  %p457_p4 = pnand %p456_p3, %p450_p0 }
  0x19   :  { %v270_v10 = vld [vmem:[#allocation4] sm:$0xff] }
  0x1a   :  { %v225_v22 = vld [vmem:[#allocation3 + $0x8] sm:$0xff] }
  0x1b   :  { %164 = vmatpush1.bf16.msra.mxu0 %v428_v14 }
  0x1c   :  { %165 = vmatprep.subr.bf16.mxu0 %v429_v15 }
  0x1f   :  { %166 = vmatpush1.bf16.msra.mxu0 %v431_v16 }
  0x22   :  { %184 = vmatmul.mubr.bf16.vlgmr.msra.gmra.mxu0 %v432_v17  ;;  %v224_v17 = vld [vmem:[#allocation3] sm:$0xff] }
  0xe2   :  { %v185_v25 = vpop.f32.mrf.mxu0 }
  0xe3   :  { %v186_v27 = vadd.f32 %v185_v25, %v58_v23 }
  0xe4   :  { %v187_v26 = vpop.f32.mrf.mxu0 }
  0xe5   :  { %v188_v28 = vadd.f32 %v187_v26, %v62_v24 }
  0xe6   :  { %v189_v29 = vpop.f32.mrf.mxu0 }
  0xe7   :  { %v394_v30 = vpack.c.bf16 %v188_v28, %v186_v27  ;;  %v210_v31 = vmax.f32 %v186_v27, %v188_v28  ;;  %v570_v33 = vadd.f32 %v189_v29, %v58_v23 }
  0xe8   :  { %v191_v32 = vpop.f32.mrf.mxu0 }
  0xe9   :  { %206 = vst [vmem:[#allocation5] sm:$0xff] %v394_v30  ;;  %v572_v34 = vadd.f32 %v191_v32, %v62_v24  ;;  %211 = vmax.xlane.f32.xlu0 %v210_v31 }
  0xeb   :  { %v395_v35 = vpack.c.bf16 %v572_v34, %v570_v33  ;;  %v213_v36 = vmax.f32 %v570_v33, %v572_v34 }
  0xed   :  { %207 = vst [vmem:[#allocation5 + $0x8] sm:$0xff] %v395_v35  ;;  %214 = vmax.xlane.f32.xlu0 %v213_v36 }
 0x103   :  { %275 = vperm.xlu0 %407, %v272_v38  }
 0x172   :  { %v212_v41 = vpop.xlane.xlu0 %211 }
 0x173   :  { %v216_v42 = vmax.f32 %v208_v40, %v212_v41  ;;  %v315_v41 = vld [vmem:[%s628_s4] sm:$0xff] }
 0x175   :  { %v218_v44 = vsub.f32 %v208_v40, %v216_v42  ;;  %261 = vst.msk [vmem:[#allocation2] sm:$0xff] %vm28_vm0, %v216_v42  ;;  %230 = vperm.xlu1 %406, %v216_v42  }
 0x176   :  { %v215_v45 = vpop.xlane.xlu0 %214 }
 0x177   :  { %v217_v47 = vmax.f32 %v209_v43, %v215_v45  ;;  %v220_v14 = vmul.f32 1.442695, %v218_v44  ;;  %v316_v44 = vld [vmem:[%s628_s4 + $0x8] sm:$0xff] }
 0x179   :  { %v219_v48 = vsub.f32 %v209_v43, %v217_v47  ;;  %262 = vst.msk [vmem:[#allocation2 + $0x8] sm:$0xff] %vm28_vm0, %v217_v47  ;;  %235 = vperm.xlu1 %406, %v217_v47  }
 0x17b   :  { %v222_v15 = vmul.f32 1.442695, %v219_v48 }
 0x17d   :  { %278 = vperm.xlu1 %406, %v273_v49  }
 0x17e   :  { %v276_v51 = vpop.permute.xlu0 %275 }
 0x17f   :  { %vm280_vm1 = vcmp.eq.s32.totalorder %v588_v46, %v276_v51  ;;  %vm281_vm2 = vcmp.eq.s32.totalorder %v265_v50, %v276_v51  ;;  %v331_v51 = vsel %vm28_vm0, %v315_v41, 0.0 }
 0x180   :  { %v284_v52 = vsel %vm280_vm1, %v186_v27, 0.0  ;;  %v285_v53 = vsel %vm281_vm2, %v188_v28, 0.0  ;;  %v302_v40 = vld [vmem:[#allocation2 + $0x8] sm:$0xff] }
 0x181   :  { %v288_v54 = vadd.f32 %v285_v53, %v284_v52  ;;  %v332_v52 = vsel %vm28_vm0, %v316_v44, 0.0 }
 0x183   :  { %289 = vadd.xlane.f32.xlu0 %v288_v54  ;;  %v333_v54 = vadd.f32 %v332_v52, %v331_v51 }
 0x1f0   :  { %v231_v55 = vpop.permute.xlu1 %230 }
 0x1f1   :  { %v238_v56 = vsub.f32 %v186_v27, %v231_v55  ;;  %v239_v57 = vsub.f32 %v188_v28, %v231_v55  ;;  %v271_v27 = vld [vmem:[#allocation4 + $0x8] sm:$0xff] }
 0x1f3   :  { %v242_v58 = vmul.f32 1.442695, %v238_v56  ;;  %v244_v59 = vmul.f32 1.442695, %v239_v57 }
 0x1f4   :  { %v236_v60 = vpop.permute.xlu1 %235 }
 0x1f5   :  { %433 = vpow2.f32 %v242_v58  ;;  %v240_v61 = vsub.f32 %v570_v33, %v236_v60  ;;  %v241_v62 = vsub.f32 %v572_v34, %v236_v60 }
 0x1f6   :  { %435 = vpow2.f32 %v244_v59 }
 0x1f7   :  { %v246_v63 = vmul.f32 1.442695, %v240_v61  ;;  %v248_v0 = vmul.f32 1.442695, %v241_v62 }
 0x1f8   :  { %v279_v3 = vpop.permute.xlu1 %278 }
 0x1f9   :  { %437 = vpow2.f32 %v246_v63  ;;  %vm282_vm3 = vcmp.eq.s32.totalorder %v588_v46, %v279_v3  ;;  %vm283_vm4 = vcmp.eq.s32.totalorder %v265_v50, %v279_v3 }
 0x1fa   :  { %439 = vpow2.f32 %v248_v0  ;;  %v286_v8 = vsel %vm282_vm3, %v570_v33, 0.0  ;;  %v287_v9 = vsel %vm283_vm4, %v572_v34, 0.0  ;;  %v301_v34 = vld [vmem:[#allocation2] sm:$0xff] }
 0x1fb   :  { %v291_v12 = vadd.f32 %v287_v9, %v286_v8  ;;  %441 = vpow2.f32 %v220_v14 }
 0x1fc   :  { %443 = vpow2.f32 %v222_v15 }
 0x202   :  { %v434_v1 = vpop.eup %433 }
 0x203   :  { %v436_v2 = vpop.eup %435 }
 0x204   :  { %v250_v4 = vadd.f32 %v436_v2, %v434_v1 }
 0x206   :  { %v438_v5 = vpop.eup %437  ;;  %251 = vadd.xlane.f32.xlu1 %v250_v4 }
 0x207   :  { %v440_v6 = vpop.eup %439 }
 0x208   :  { %v253_v7 = vadd.f32 %v440_v6, %v438_v5  ;;  %v442_v16 = vpop.eup %441 }
 0x209   :  { %v226_v18 = vmul.f32 %v442_v16, %v224_v17  ;;  %v444_v20 = vpop.eup %443 }
 0x20a   :  { %254 = vadd.xlane.f32.xlu1 %v253_v7  ;;  %v227_v24 = vmul.f32 %v444_v20, %v225_v22 }
 0x20c   :  { %v290_v11 = vpop.xlane.xlu0 %289 }
 0x20d   :  { %v294_v13 = vadd.f32 %v290_v11, %v270_v10 }
 0x20e   :  { %292 = vadd.xlane.f32.xlu1 %v291_v12 }
 0x20f   :  { %296 = vst.msk [vmem:[#allocation4] sm:$0xff] %vm28_vm0, %v294_v13 }
 0x216   :  { %v311_v37 = vld [vmem:[#allocation4] sm:$0xff] }
 0x28f   :  { %v252_v21 = vpop.xlane.xlu1 %251 }
 0x290   :  { %v256_v23 = vadd.f32 %v252_v21, %v226_v18 }
 0x292   :  { %259 = vst.msk [vmem:[#allocation3] sm:$0xff] %vm28_vm0, %v256_v23 }
 0x293   :  { %v255_v25 = vpop.xlane.xlu1 %254 }
 0x294   :  { %v257_v26 = vadd.f32 %v255_v25, %v227_v24 }
 0x296   :  { %260 = vst.msk [vmem:[#allocation3 + $0x8] sm:$0xff] %vm28_vm0, %v257_v26 }
 0x297   :  { %v293_v28 = vpop.xlane.xlu1 %292 }
 0x298   :  { %v295_v29 = vadd.f32 %v293_v28, %v271_v27 }
 0x299   :  { %v303_v30 = vld [vmem:[#allocation3] sm:$0xff] }
 0x29a   :  { %297 = vst.msk [vmem:[#allocation4 + $0x8] sm:$0xff] %vm28_vm0, %v295_v29  ;;  %445 = vlog2.f32 %v303_v30 }
 0x29d   :  { %v304_v31 = vld [vmem:[#allocation3 + $0x8] sm:$0xff] }
 0x29e   :  { %447 = vlog2.f32 %v304_v31 }
 0x2a1   :  { %v312_v43 = vld [vmem:[#allocation4 + $0x8] sm:$0xff] }
 0x2a7   :  { %v446_v32 = vpop.eup %445 }
 0x2a8   :  { %v306_v33 = vmul.f32 0.6931472, %v446_v32 }
 0x2aa   :  { %v309_v35 = vadd.f32 %v306_v33, %v301_v34 }
 0x2ab   :  { %v448_v36 = vpop.eup %447 }
 0x2ac   :  { %v308_v38 = vmul.f32 0.6931472, %v448_v36  ;;  %v313_v39 = vsub.f32 %v309_v35, %v311_v37 }
 0x2ae   :  { %v310_v42 = vadd.f32 %v308_v38, %v302_v40  ;;  %v317_v47 = vmul.f32 %v315_v41, %v313_v39 }
 0x2b0   :  { %v314_v45 = vsub.f32 %v310_v42, %v312_v43  ;;  %v319_v49 = vsel %vm28_vm0, %v317_v47, 0.0 }
 0x2b2   :  { %v318_v48 = vmul.f32 %v316_v44, %v314_v45 }
 0x2b4   :  { %v320_v50 = vsel %vm28_vm0, %v318_v48, 0.0 }
 0x2b5   :  { %v321_v53 = vadd.f32 %v320_v50, %v319_v49 }
 0x2b7   :  { %322 = vadd.xlane.f32.xlu1 %v321_v53 }
 0x2bb   :  { %334 = vadd.xlane.f32.xlu1 %v333_v54 }
 0x2bc   :  { %460 = shalt.err (!%p457_p4)
}
 0x2bd   :  { %s475_s4 = smov 128   ;;  %s476_s16 = smov 8   ;;  %vm345_vm5 = vcmp.eq.s32.totalorder %v563_v19, 0  ;;  %vm348_vm6 = vcmp.eq.s32.totalorder %v588_v46, 1  ;;  %vm346_vm7 = vcmp.eq.s32.totalorder %v588_v46, 0 }
 0x2be   :  { %366 = dma.vmem_to_hbm [thread:$0]  %s361_s14, 256, %s629_s5, [#allocation6], %s475_s4, %s475_s4, %s476_s16   ;;  %vm349_vm8 = vmand %vm345_vm5, %vm348_vm6 }
 0x2bf   :  { %vm347_vm9 = vmand %vm345_vm5, %vm346_vm7 }
 0x340   :  { %v323_v55 = vpop.xlane.xlu1 %322 }
 0x341   :  { %v324_v56 = vrot.slane %v323_v55, 4 }
 0x343   :  { %v325_v57 = vadd.f32 %v324_v56, %v323_v55 }
 0x344   :  { %v335_v58 = vpop.xlane.xlu1 %334 }
 0x345   :  { %v326_v59 = vrot.slane %v325_v57, 2  ;;  %v336_v60 = vrot.slane %v335_v58, 4 }
 0x347   :  { %v337_v61 = vadd.f32 %v336_v60, %v335_v58  ;;  %v327_v62 = vadd.f32 %v326_v59, %v325_v57 }
 0x349   :  { %v338_v63 = vrot.slane %v337_v61, 2  ;;  %v328_v0 = vrot.slane %v327_v62, 1 }
 0x34b   :  { %v339_v1 = vadd.f32 %v338_v63, %v337_v61  ;;  %v329_v2 = vadd.f32 %v328_v0, %v327_v62 }
 0x34d   :  { %396 = vpush %v329_v2  ;;  %v340_v3 = vrot.slane %v339_v1, 1 }
 0x34f   :  { %v341_v4 = vadd.f32 %v340_v3, %v339_v1 }
 0x351   :  { %398 = vpush %v341_v4 }
 0x37e   :  { %s397_s5 = spop %396 }
 0x37f   :  { %v352_v6 = vstv %s397_s5 }
 0x382   :  { %s399_s19 = spop %398 }
 0x383   :  { %v350_v5 = vstv %s399_s19 }
 0x384   :  { %v351_v7 = vsel %vm349_vm8, %v350_v5, 0.0 }
 0x385   :  { %v353_v8 = vsel %vm347_vm9, %v352_v6, %v351_v7 }
 0x386   :  { %354 = vst [vmem:[%s630_s6] sm:$0xff] %v353_v8 }
 0x387   :  { %469 = dma.done.wait [#allocation6], 256  }
 0x388   :  { %470 = vsyncadd [#allocation6], 4294967040 }
 0x389   :  { %374 = vsyncpa [#allocation6], 1 }

</bundles_post_ra>
